<compile_context>
chip_gen: v7x
topology: tpu7x:2x2x1
jax: 0.10.0
libtpu: 0.0.40
codegen_flags: <defaults>
</compile_context>

<pallas_src>
import jax
import jax.numpy as jnp
from jax.experimental import pallas as pl
from jax.experimental.pallas import tpu as pltpu


def _attention_kernel(g_ref, x_ref, w_ref, b_ref, wpsi_ref, bpsi_ref,
                      out_ref, gx_ref):
    """One (batch, spatial-tile) grid step.

    g_ref:    (F_g,  ts)          bf16 gating features (channels on sublanes)
    x_ref:    (F_l,  ts)          bf16 skip features
    w_ref:    (F_ip, F_gp + F_l)  bf16 fused, BN-folded [W_g | 0 | W_x] weight
    b_ref:    (F_ip, 1)           f32  fused, BN-folded bias (b_g + b_x)
    wpsi_ref: (F_ip, 1)           f32  BN-folded psi weight
    bpsi_ref: (1, 1)              f32  BN-folded psi bias
    out_ref:  (F_l,  ts)          x * sigmoid(psi)
    gx_ref:   (F_gp + F_l, ts)    bf16 VMEM scratch: [g ; 0-pad ; x] staging
    """
    f_g = g_ref.shape[0]
    f_l = x_ref.shape[0]
    f_gp = gx_ref.shape[0] - f_l            # sublane-aligned offset of x rows
    ts = g_ref.shape[1]

    x = x_ref[...]

    # Stage [g ; x] once in VMEM so both 1x1 convs fuse into a single MXU
    # matmul with a full (F_g + F_l) contraction.  All stores start at
    # sublane-aligned offsets (0 and f_gp, a multiple of 16).
    if f_gp > f_g:                          # static: zero the alignment gap
        gx_ref[pl.ds(0, f_gp), :] = jnp.zeros((f_gp, ts), dtype=gx_ref.dtype)
    gx_ref[pl.ds(0, f_g), :] = g_ref[...]
    gx_ref[pl.ds(f_gp, f_l), :] = x

    # Fused 1x1 convs as one channel matmul (bf16 operands, f32 accumulation).
    p = jnp.dot(w_ref[...], gx_ref[...], preferred_element_type=jnp.float32)
    p = jnp.maximum(p + b_ref[...], 0.0)                       # ReLU, (F_ip, ts)

    # psi has a single output channel: VPU multiply + sublane reduce instead
    # of burning an MXU pass to fill one column (kernel is HBM-bound anyway).
    psi_logit = jnp.sum(p * wpsi_ref[...], axis=0, keepdims=True) + bpsi_ref[...]
    psi = jax.nn.sigmoid(psi_logit)                            # (1, ts) f32

    # Gating epilogue in bf16 (native on v6e/v7x VALUs; v5e upconverts).
    out_ref[...] = (x * psi.astype(x.dtype)).astype(out_ref.dtype)


def _fold_bn(w, b, gamma, beta, mean, var, eps=1e-5):
    """Fold inference-mode BatchNorm into a 1x1 conv (w: (Cin, Cout))."""
    s = gamma / jnp.sqrt(var + eps)               # (Cout,)
    return w * s[None, :], (b - mean) * s + beta


def _round_up(v, m):
    return ((v + m - 1) // m) * m


def _vmem_capacity_bytes():
    """Per-core VMEM capacity; conservative (v7x) fallback if unavailable."""
    try:
        return int(pltpu.get_tpu_info().vmem_capacity_bytes)
    except Exception:
        return 64 << 20


def _pick_spatial_tile(hw, f_g, f_l, f_ip, f_gp, out_bpe, vmem_cap):
    """Largest lane-dense spatial tile whose working set fits the VMEM budget.

    Working set = double-buffered streamed tiles + bf16 [g;x] staging scratch
    + the per-step f32 intermediates (p, psi, epilogue temps).
    """
    if hw < 128:
        return hw                                  # full-extent lane block
    # ~25 MiB of tiles on 64 MiB (v7x) chips, up to 48 MiB on 128 MiB chips.
    budget = int(min(0.40 * vmem_cap, 48 << 20))
    hw_cap = _round_up(hw, 128)
    for cand in (8192, 4096, 2048, 1024, 512, 256, 128):
        if cand > hw_cap:
            continue
        stream = 2 * cand * ((f_g + f_l) * 2 + f_l * out_bpe)  # dbl-buffered I/O
        scratch = cand * (f_gp + f_l) * 2                      # [g;x] staging
        interm = cand * (2 * f_ip + f_l + 2) * 4               # f32 intermediates
        if stream + scratch + interm <= budget:
            return cand
    return 128


@jax.jit
def attention_block(g, x, params):
    """g, x: NCHW.  Returns x * psi, NCHW (same dtype as x)."""
    N, F_g, H, W = g.shape
    _, F_l, _, _ = x.shape
    F_int = params["wg"].shape[1]
    HW = H * W
    out_dtype = x.dtype
    out_bpe = jnp.dtype(out_dtype).itemsize

    # Fold eval-mode BatchNorm into each 1x1 conv (plain-JAX glue).
    wg, bg = _fold_bn(params["wg"], params["bg"], params["bn_g_gamma"],
                      params["bn_g_beta"], params["bn_g_mean"], params["bn_g_var"])
    wx, bx = _fold_bn(params["wx"], params["bx"], params["bn_x_gamma"],
                      params["bn_x_beta"], params["bn_x_mean"], params["bn_x_var"])
    wpsi, bpsi = _fold_bn(params["wpsi"], params["bpsi"], params["bn_p_gamma"],
                          params["bn_p_beta"], params["bn_p_mean"], params["bn_p_var"])

    # Pad F_int to f32 sublane packing (8) and place W_x at a bf16-tile
    # aligned (16) sublane offset so the in-kernel [g ; x] staging stores are
    # aligned.  Padded rows/cols are exact zeros (no accuracy impact).
    F_ip = _round_up(F_int, 8)
    F_gp = _round_up(F_g, 16)

    w_cat = jnp.zeros((F_ip, F_gp + F_l), jnp.float32)
    w_cat = w_cat.at[:F_int, :F_g].set(wg.T)
    w_cat = w_cat.at[:F_int, F_gp:].set(wx.T)
    w_cat = w_cat.astype(jnp.bfloat16)                         # (F_ip, F_gp+F_l)
    b_gx = jnp.zeros((F_ip, 1), jnp.float32).at[:F_int, 0].set(bg + bx)
    wpsi_c = jnp.zeros((F_ip, 1), jnp.float32).at[:F_int, 0].set(wpsi[:, 0])
    bpsi_c = bpsi.reshape(1, 1).astype(jnp.float32)

    # NCHW -> (N, C, HW): pure reshape (no transpose, no extra HBM pass).
    # bf16 activations halve kernel HBM traffic and run the MXU at bf16 rate;
    # the cast is a no-op when the surrounding network is already bf16.
    g3 = g.reshape(N, F_g, HW).astype(jnp.bfloat16)
    x3 = x.reshape(N, F_l, HW).astype(jnp.bfloat16)

    vmem_cap = _vmem_capacity_bytes()
    ts = _pick_spatial_tile(HW, F_g, F_l, F_ip, F_gp, out_bpe, vmem_cap)
    # Guarantee >= 2 parallel grid steps so both v7x TensorCores get work.
    while N * pl.cdiv(HW, ts) < 2 and ts > 128:
        ts //= 2
    grid = (N, pl.cdiv(HW, ts))          # ragged HW: partial last block, no pad

    def row_spec(c):
        return pl.BlockSpec((None, c, ts), lambda n, s: (n, 0, s))

    def full_spec(shape):
        return pl.BlockSpec(shape, lambda n, s: (0, 0))

    # VMEM accounting: double-buffered streamed tiles + staging scratch + f32
    # intermediates + resident weights.  Cap ~48 MiB on v7x (64 MiB/TC); allow
    # more on v5e/v6e (128 MiB).
    stream = 2 * ts * ((F_g + F_l) * 2 + F_l * out_bpe)
    scratch = ts * (F_gp + F_l) * 2
    interm = ts * (2 * F_ip + F_l + 2) * 4
    weight_bytes = 2 * F_ip * (F_gp + F_l) + 4 * (2 * F_ip + 1)
    hard_cap = (48 << 20) if vmem_cap <= (64 << 20) else (100 << 20)
    vmem_limit = int(min(max(stream + scratch + interm + weight_bytes + (4 << 20),
                             16 << 20), hard_cap))

    M = N * HW
    cost = pl.CostEstimate(
        flops=2 * M * F_int * (F_g + F_l) + 4 * M * F_int + 2 * M * F_l,
        transcendentals=M,
        bytes_accessed=M * (F_g + F_l) * 2 + M * F_l * out_bpe + weight_bytes,
    )

    out3 = pl.pallas_call(
        _attention_kernel,
        out_shape=jax.ShapeDtypeStruct((N, F_l, HW), out_dtype),
        grid_spec=pltpu.PrefetchScalarGridSpec(
            num_scalar_prefetch=0,
            grid=grid,
            in_specs=[
                row_spec(F_g),                    # g tile       (F_g, ts)
                row_spec(F_l),                    # x tile       (F_l, ts)
                full_spec((F_ip, F_gp + F_l)),    # fused [Wg|Wx] (transposed)
                full_spec((F_ip, 1)),             # b_g + b_x
                full_spec((F_ip, 1)),             # wpsi
                full_spec((1, 1)),                # bpsi
            ],
            out_specs=row_spec(F_l),              # out tile     (F_l, ts)
            scratch_shapes=[pltpu.VMEM((F_gp + F_l, ts), jnp.bfloat16)],
        ),
        compiler_params=pltpu.CompilerParams(
            dimension_semantics=("parallel", "parallel"),
            vmem_limit_bytes=vmem_limit),
        cost_estimate=cost,
    )(g3, x3, w_cat, b_gx, wpsi_c, bpsi_c)

    return out3.reshape(N, F_l, H, W)


def _reference(g, x, params):
    """Plain-JAX f32 reference of the same (eval-mode-BN) forward pass."""
    wg, bg = _fold_bn(params["wg"], params["bg"], params["bn_g_gamma"],
                      params["bn_g_beta"], params["bn_g_mean"], params["bn_g_var"])
    wx, bx = _fold_bn(params["wx"], params["bx"], params["bn_x_gamma"],
                      params["bn_x_beta"], params["bn_x_mean"], params["bn_x_var"])
    wpsi, bpsi = _fold_bn(params["wpsi"], params["bpsi"], params["bn_p_gamma"],
                          params["bn_p_beta"], params["bn_p_mean"], params["bn_p_var"])
    g1 = jnp.einsum("nchw,cf->nfhw", g, wg) + bg[None, :, None, None]
    x1 = jnp.einsum("nchw,cf->nfhw", x, wx) + bx[None, :, None, None]
    p = jnp.maximum(g1 + x1, 0.0)
    psi = jax.nn.sigmoid(jnp.einsum("nfhw,fo->nohw", p, wpsi)
                         + bpsi[None, :, None, None])
    return x * psi


def init_params(key, F_g, F_l, F_int):
    ks = jax.random.split(key, 6)
    return {
        # Conv weights stored as (Cin, Cout).
        "wg": jax.random.normal(ks[0], (F_g, F_int), jnp.float32) * 0.1,
        "bg": jax.random.normal(ks[1], (F_int,), jnp.float32) * 0.1,
        "wx": jax.random.normal(ks[2], (F_l, F_int), jnp.float32) * 0.1,
        "bx": jax.random.normal(ks[3], (F_int,), jnp.float32) * 0.1,
        "wpsi": jax.random.normal(ks[4], (F_int, 1), jnp.float32) * 0.1,
        "bpsi": jax.random.normal(ks[5], (1,), jnp.float32) * 0.1,
        # Inference-mode BatchNorm params: non-trivial gamma/beta so the
        # folding is exercised; fresh running stats (0 / 1).
        "bn_g_gamma": jnp.linspace(0.8, 1.2, F_int, dtype=jnp.float32),
        "bn_g_beta": jnp.linspace(-0.1, 0.1, F_int, dtype=jnp.float32),
        "bn_g_mean": jnp.zeros((F_int,), jnp.float32),
        "bn_g_var": jnp.ones((F_int,), jnp.float32),
        "bn_x_gamma": jnp.linspace(1.1, 0.9, F_int, dtype=jnp.float32),
        "bn_x_beta": jnp.linspace(0.05, -0.05, F_int, dtype=jnp.float32),
        "bn_x_mean": jnp.zeros((F_int,), jnp.float32),
        "bn_x_var": jnp.ones((F_int,), jnp.float32),
        "bn_p_gamma": jnp.array([1.05], jnp.float32),
        "bn_p_beta": jnp.array([0.02], jnp.float32),
        "bn_p_mean": jnp.zeros((1,), jnp.float32),
        "bn_p_var": jnp.ones((1,), jnp.float32),
    }


if __name__ == "__main__":
    key = jax.random.PRNGKey(0)
    k_g, k_x, k_p, k_g2, k_x2 = jax.random.split(key, 5)

    N, F_g, F_l, F_int, H, W = 2, 4, 4, 8, 16, 16
    g = jax.random.normal(k_g, (N, F_g, H, W), jnp.float32)
    x = jax.random.normal(k_x, (N, F_l, H, W), jnp.float32)
    params = init_params(k_p, F_g, F_l, F_int)

    out = attention_block(g, x, params)
    out = jax.block_until_ready(out)
    ref = _reference(g, x, params)
    assert out.shape == x.shape, (out.shape, x.shape)
    # bf16 activations/weights (f32 accumulation) -> loosened tolerance.
    assert jnp.allclose(out, ref, atol=2e-2, rtol=2e-2), "mismatch vs reference"

    # Ragged-HW case (H*W not a multiple of the spatial tile) exercises the
    # cdiv grid / masked partial last block — no wrapper pad/slice passes.
    H2, W2 = 10, 30
    g2 = jax.random.normal(k_g2, (N, F_g, H2, W2), jnp.float32)
    x2 = jax.random.normal(k_x2, (N, F_l, H2, W2), jnp.float32)
    out2 = jax.block_until_ready(attention_block(g2, x2, params))
    ref2 = _reference(g2, x2, params)
    assert out2.shape == x2.shape, (out2.shape, x2.shape)
    assert jnp.allclose(out2, ref2, atol=2e-2, rtol=2e-2), "ragged mismatch"

    print("KERNEL_OK")
</pallas_src>

<mosaic_0001>
module attributes {stable_mosaic.version = 11 : i64} {
  func.func @_attention_kernel(%arg0: i32, %arg1: i32, %arg2: memref<1x4x256xbf16, #tpu.memory_space<vmem>>, %arg3: memref<1x4x256xbf16, #tpu.memory_space<vmem>>, %arg4: memref<8x20xbf16, #tpu.memory_space<vmem>>, %arg5: memref<8x1xf32, #tpu.memory_space<vmem>>, %arg6: memref<8x1xf32, #tpu.memory_space<vmem>>, %arg7: memref<1x1xf32, #tpu.memory_space<vmem>>, %arg8: memref<1x4x256xf32, #tpu.memory_space<vmem>>, %arg9: memref<20x256xbf16, #tpu.memory_space<vmem>>) attributes {dimension_semantics = [#tpu.dimension_semantics<parallel>, #tpu.dimension_semantics<parallel>], iteration_bounds = array<i64: 2, 1>, scalar_prefetch = 0 : i64, scratch_operands = 1 : i64, tpu.core_type = #tpu.core_type<tc>, window_params = [{transform_indices = @transform_0, window_bounds = array<i64: 1, 4, 256>}, {transform_indices = @transform_1, window_bounds = array<i64: 1, 4, 256>}, {pipeline_mode = #tpu.pipeline_mode<synchronous>, transform_indices = @transform_2, window_bounds = array<i64: 8, 20>}, {pipeline_mode = #tpu.pipeline_mode<synchronous>, transform_indices = @transform_3, window_bounds = array<i64: 8, 1>}, {pipeline_mode = #tpu.pipeline_mode<synchronous>, transform_indices = @transform_4, window_bounds = array<i64: 8, 1>}, {pipeline_mode = #tpu.pipeline_mode<synchronous>, transform_indices = @transform_5, window_bounds = array<i64: 1, 1>}, {transform_indices = @transform_6, window_bounds = array<i64: 1, 4, 256>}]} {
    %c0 = arith.constant 0 : index
    %c0_0 = arith.constant 0 : index
    %c0_1 = arith.constant 0 : index
    %0 = vector.load %arg3[%c0, %c0_0, %c0_1] : memref<1x4x256xbf16, #tpu.memory_space<vmem>>, vector<1x4x256xbf16>
    %1 = vector.shape_cast %0 : vector<1x4x256xbf16> to vector<4x256xbf16>
    %cst = arith.constant 0.000000e+00 : bf16
    %2 = vector.broadcast %cst : bf16 to vector<16x256xbf16>
    %c0_2 = arith.constant 0 : index
    %c0_3 = arith.constant 0 : index
    %3 = vector.load %arg9[%c0_2, %c0_3] : memref<20x256xbf16, #tpu.memory_space<vmem>>, vector<16x256xbf16>
    tpu.vector_store %arg9[%c0_2, %c0_3], %2 {strides = array<i32>} : memref<20x256xbf16, #tpu.memory_space<vmem>>, vector<16x256xbf16>,
    %c0_4 = arith.constant 0 : index
    %c0_5 = arith.constant 0 : index
    %c0_6 = arith.constant 0 : index
    %4 = vector.load %arg2[%c0_4, %c0_5, %c0_6] : memref<1x4x256xbf16, #tpu.memory_space<vmem>>, vector<1x4x256xbf16>
    %5 = vector.shape_cast %4 : vector<1x4x256xbf16> to vector<4x256xbf16>
    %c0_7 = arith.constant 0 : index
    %c0_8 = arith.constant 0 : index
    %6 = vector.load %arg9[%c0_7, %c0_8] : memref<20x256xbf16, #tpu.memory_space<vmem>>, vector<4x256xbf16>
    tpu.vector_store %arg9[%c0_7, %c0_8], %5 {strides = array<i32>} : memref<20x256xbf16, #tpu.memory_space<vmem>>, vector<4x256xbf16>,
    %c16 = arith.constant 16 : index
    %c0_9 = arith.constant 0 : index
    %7 = vector.load %arg9[%c16, %c0_9] : memref<20x256xbf16, #tpu.memory_space<vmem>>, vector<4x256xbf16>
    tpu.vector_store %arg9[%c16, %c0_9], %1 {strides = array<i32>} : memref<20x256xbf16, #tpu.memory_space<vmem>>, vector<4x256xbf16>,
    %c0_10 = arith.constant 0 : index
    %c0_11 = arith.constant 0 : index
    %8 = vector.load %arg4[%c0_10, %c0_11] : memref<8x20xbf16, #tpu.memory_space<vmem>>, vector<8x20xbf16>
    %c0_12 = arith.constant 0 : index
    %c0_13 = arith.constant 0 : index
    %9 = vector.load %arg9[%c0_12, %c0_13] : memref<20x256xbf16, #tpu.memory_space<vmem>>, vector<20x256xbf16>
    %cst_14 = arith.constant dense<0.000000e+00> : vector<8x256xf32>
    %10 = tpu.matmul %8, %9, %cst_14 {dimension_numbers = #tpu.dot_dimension_numbers<[1], [0], [0], [1], [0, 0, 1, 1], [], []>} : vector<8x20xbf16>, vector<20x256xbf16>, vector<8x256xf32> -> vector<8x256xf32>
    %c0_15 = arith.constant 0 : index
    %c0_16 = arith.constant 0 : index
    %11 = vector.load %arg5[%c0_15, %c0_16] : memref<8x1xf32, #tpu.memory_space<vmem>>, vector<8x1xf32>
    %12 = vector.broadcast %11 : vector<8x1xf32> to vector<8x256xf32>
    %13 = arith.addf %10, %12 : vector<8x256xf32>
    %cst_17 = arith.constant 0.000000e+00 : f32
    %14 = vector.broadcast %cst_17 : f32 to vector<8x256xf32>
    %15 = arith.maximumf %13, %14 : vector<8x256xf32>
    %c0_18 = arith.constant 0 : index
    %c0_19 = arith.constant 0 : index
    %16 = vector.load %arg6[%c0_18, %c0_19] : memref<8x1xf32, #tpu.memory_space<vmem>>, vector<8x1xf32>
    %17 = vector.broadcast %16 : vector<8x1xf32> to vector<8x256xf32>
    %18 = arith.mulf %15, %17 : vector<8x256xf32>
    %cst_20 = arith.constant dense<0.000000e+00> : vector<256xf32>
    %19 = vector.multi_reduction <add>, %18, %cst_20 [0] : vector<8x256xf32> to vector<256xf32>
    %20 = vector.shape_cast %19 : vector<256xf32> to vector<1x256xf32>
    %c0_21 = arith.constant 0 : index
    %c0_22 = arith.constant 0 : index
    %21 = vector.load %arg7[%c0_21, %c0_22] : memref<1x1xf32, #tpu.memory_space<vmem>>, vector<1x1xf32>
    %22 = vector.broadcast %21 : vector<1x1xf32> to vector<1x256xf32>
    %23 = arith.addf %20, %22 : vector<1x256xf32>
    %24 = arith.negf %23 : vector<1x256xf32>
    %25 = math.exp %24 : vector<1x256xf32>
    %cst_23 = arith.constant 1.000000e+00 : f32
    %26 = vector.broadcast %cst_23 : f32 to vector<1x256xf32>
    %27 = arith.addf %26, %25 : vector<1x256xf32>
    %28 = arith.divf %26, %27 : vector<1x256xf32>
    %29 = arith.truncf %28 : vector<1x256xf32> to vector<1x256xbf16>
    %30 = vector.broadcast %29 : vector<1x256xbf16> to vector<4x256xbf16>
    %31 = arith.mulf %1, %30 : vector<4x256xbf16>
    %32 = arith.extf %31 : vector<4x256xbf16> to vector<4x256xf32>
    %c0_24 = arith.constant 0 : index
    %c0_25 = arith.constant 0 : index
    %c0_26 = arith.constant 0 : index
    %33 = vector.load %arg8[%c0_24, %c0_25, %c0_26] : memref<1x4x256xf32, #tpu.memory_space<vmem>>, vector<1x4x256xf32>
    %34 = vector.shape_cast %33 : vector<1x4x256xf32> to vector<4x256xf32>
    %35 = vector.shape_cast %32 : vector<4x256xf32> to vector<1x4x256xf32>
    tpu.vector_store %arg8[%c0_24, %c0_25, %c0_26], %35 {strides = array<i32>} : memref<1x4x256xf32, #tpu.memory_space<vmem>>, vector<1x4x256xf32>,
    return
  }
  func.func @transform_0(%arg0: i32, %arg1: i32) -> (i32, i32, i32) {
    %c0_i32 = arith.constant 0 : i32
    %c0_i32_0 = arith.constant 0 : i32
    return %arg0, %c0_i32, %arg1 : i32, i32, i32
  }
  func.func @transform_1(%arg0: i32, %arg1: i32) -> (i32, i32, i32) {
    %c0_i32 = arith.constant 0 : i32
    %c0_i32_0 = arith.constant 0 : i32
    return %arg0, %c0_i32, %arg1 : i32, i32, i32
  }
  func.func @transform_2(%arg0: i32, %arg1: i32) -> (i32, i32) {
    %c0_i32 = arith.constant 0 : i32
    %c0_i32_0 = arith.constant 0 : i32
    %c0_i32_1 = arith.constant 0 : i32
    return %c0_i32, %c0_i32_0 : i32, i32
  }
  func.func @transform_3(%arg0: i32, %arg1: i32) -> (i32, i32) {
    %c0_i32 = arith.constant 0 : i32
    %c0_i32_0 = arith.constant 0 : i32
    %c0_i32_1 = arith.constant 0 : i32
    return %c0_i32, %c0_i32_0 : i32, i32
  }
  func.func @transform_4(%arg0: i32, %arg1: i32) -> (i32, i32) {
    %c0_i32 = arith.constant 0 : i32
    %c0_i32_0 = arith.constant 0 : i32
    %c0_i32_1 = arith.constant 0 : i32
    return %c0_i32, %c0_i32_0 : i32, i32
  }
  func.func @transform_5(%arg0: i32, %arg1: i32) -> (i32, i32) {
    %c0_i32 = arith.constant 0 : i32
    %c0_i32_0 = arith.constant 0 : i32
    %c0_i32_1 = arith.constant 0 : i32
    return %c0_i32, %c0_i32_0 : i32, i32
  }
  func.func @transform_6(%arg0: i32, %arg1: i32) -> (i32, i32, i32) {
    %c0_i32 = arith.constant 0 : i32
    %c0_i32_0 = arith.constant 0 : i32
    return %arg0, %c0_i32, %arg1 : i32, i32, i32
  }
}

</mosaic_0001>

<bundles_post_ra>
// kernel: attention_block.1
= control target key start
LH: loop header
LB: loop body
LE: loop exit
PB: predicated region body
PF: predicated region fallthrough
CT: control target
= control target key end

     0   :  { %s727_s23 = smov 0   ;;  %s729_s24 = smov 0   ;;  %s780_s0 = inlined_call_operand.vmem [shape: bf16[2,4,256], index: 0, kind: input, shape index: {}]   ;;  %s781_s1 = inlined_call_operand.vmem [shape: bf16[2,4,256], index: 1, kind: input, shape index: {}]   ;;  %s782_s2 = inlined_call_operand.vmem [shape: bf16[8,20], index: 2, kind: input, shape index: {}]   ;;  %s783_s3 = inlined_call_operand.vmem [shape: f32[8,1], index: 3, kind: input, shape index: {}]   ;;  %s784_s4 = inlined_call_operand.vmem [shape: f32[8,1], index: 4, kind: input, shape index: {}]   ;;  %s785_s5 = inlined_call_operand.<no memory space> [shape: f32[1,1], index: 5, kind: input, shape index: {}]   ;;  %s786_s6 = inlined_call_operand.vmem [shape: f32[2,4,256], index: 6, kind: output, shape index: {}]  }
   0x1   :  { %v11_v0 = vstv %s785_s5  ;;  %s731_s25 = smov 0  }
   0x2   :  { %12 = vst [vmem:[#allocation3] sm:$0x1] %v11_v0 }
   0x3 LB: > { %s30_s5 = sadd.s32 1, %s681_s24  ;;  %p602_p0 = scmp.ge.s32.totalorder %s685_s25, 1  ;;  %s685_s25 = sphi %s731_s25, %s18_s25   ;;  %s681_s24 = sphi %s729_s24, %s788_s24   ;;  %s677_s23 = sphi %s727_s23, %s787_s23  }
   0x4   : > { %p32_p1 = scmp.ge.s32.totalorder %s30_s5, 2  ;;  %p252_p2 = scmp.lt.s32.totalorder %s685_s25, 3 }
   0x6   : > { %s790_s5 = smov (%p32_p1, %s30_s5), 0  ;;  %p253_p3 = pnand %p602_p0, %p252_p2 }
   0x7   : > { %p300_p4 = scmp.lt.s32.totalorder (!%p253_p3), %s677_s23, 1  ;;  %v687_v1 = vmov (!%p253_p3), 0   ;;  %v358_v2 = vld [vmem:[%s783_s3] sm:$0xff] (!%p253_p3)  ;;  %vm383_vm0 = vcmask (!%p253_p3), 1041408   ;;  %vm379_vm1 = vcmask (!%p253_p3), 162816   ;;  %v459_v23 = vlaneseq (!%p253_p3) }
   0x8   : > { %256 = sbr.rel (%p253_p3) target bundleno = 306 (0x132), region = 44  ;;  %331 = vst [vmem:[#allocation2] sm:$0xff] (!%p253_p3), %v687_v1  ;;  %422 = vmatprep.mubr.bf16.mxu0 (!%p253_p3), %v687_v1  ;;  %651 = vset.pattern.permute.xlu0 (!%p253_p3), %v687_v1  ;;  %v433_v4 = vld [vmem:[%s784_s4] sm:$0xff] (!%p253_p3)  ;;  %v688_v52 = vmov (!%p253_p3), 1983009808  }
   0x9   : > { %v453_v3 = vld [vmem:[#allocation3] sm:$0x1] (!%p253_p3)  ;;  %361 = vperm.xlu0 (!%p253_p3), %651, %v358_v2   ;;  %652 = vset.pattern.permute.xlu1 (!%p253_p3), %v687_v1  ;;  %v354_v14 = vld [vmem:[%s782_s2] sm:$0xf] (!%p253_p3)  ;;  %v460_v29 = vshrl.u32 (!%p253_p3), %v459_v23, 7  ;;  %v483_v53 = vunpack.c.l.s4 (!%p253_p3), %v688_v52 }
   0xa   : > { %456 = vperm.xlu1 (!%p253_p3), %652, %v453_v3  }
   0xb   : > { %v461_v34 = vsub.s32 (!%p253_p3), 0, %v460_v29  ;;  %v484_v54 = vunpack.c.0.s8 (!%p253_p3), %v483_v53 }
   0xd   : > { %436 = vperm.xlu0 (!%p253_p3), %651, %v433_v4   ;;  %v487_v56 = vsub.s32 (!%p253_p3), %v484_v54, %v460_v29 }
   0xf   : > { %s792_s23 = smov (!%p300_p4, %s677_s23), 1 }
  0x10   : > { %s622_s30 = sshll.u32 %s792_s23, 2  ;;  %s624_s15 = sshll.u32 %s792_s23, 3 }
  0x11   : > { %s307_s9 = scalar_lea.vmem %s780_s0, %s622_s30  ;;  %s317_s12 = scalar_lea.vmem %s781_s1, %s622_s30 }
  0x12   : > { %v760_v5 = vld [vmem:[%s317_s12] sm:$0xf]  ;;  %s327_s18 = scalar_lea.vmem %s786_s6, %s624_s15 }
  0x13   : > { %v609_v6 = vld.sshfl [vmem:[%s307_s9] sm:$0x33 pattern:$0x76325410] }
  0x14   : > { %343 = vst [vmem:[#allocation2] sm:$0x33] %v609_v6  ;;  %610 = vst.sshfl [vmem:[#allocation2 + $0x10] sm:$0xf pattern:$0x76325410] %v760_v5 }
  0x1b   : > { %v355_v7 = vld [vmem:[#allocation2] sm:$0xff]  ;;  %v357_v8 = vld [vmem:[#allocation2 + $0x10] sm:$0x33] }
  0x1c   : > { %v612_v9 = vcombine.high %v355_v7, %v687_v1  ;;  %v611_v10 = vcombine.low %v355_v7, %v687_v1  ;;  %v614_v11 = vcombine.high %v357_v8, %v357_v8  ;;  %v613_v12 = vcombine.low %v357_v8, %v357_v8 }
  0x1e   : > { %390 = vmatprep.subr.bf16.mxu0 %v612_v9  ;;  %v385_v13 = vsel %vm383_vm0, %v613_v12, 0 }
  0x1f   : > { %391 = vmatpush1.bf16.msra.mxu0 %v611_v10 }
  0x20   : > { %615 = vmatprep.subr.msk.bf16.mxu0 %vm383_vm0, %v614_v11 }
  0x23   : > { %393 = vmatpush1.bf16.msra.mxu0 %v385_v13 }
  0x26   : > { %616 = vmatmul.mubr.msk.bf16.vlgmr.msra.gmra.mrb[0].mxu0 %vm379_vm1, %v354_v14 }
  0x88   : > { %v362_v15 = vpop.permute.xlu0 %361 }
  0x89   : > { %v457_v36 = vpop.permute.xlu1 %456 }
  0x8a   : > { %v462_v40 = vrot.slane %v457_v36, %v461_v34 }
  0x8c   : > { %v437_v24 = vpop.permute.xlu0 %436 }
  0xf9   : > { %v424_v16 = vpop.f32.mrb[0].mxu0 }
  0xfa   : > { %v425_v17 = vadd.f32 %v424_v16, %v362_v15  ;;  %v426_v18 = vpop.f32.mrb[1].mxu0 }
  0xfb   : > { %v427_v19 = vadd.f32 %v426_v18, %v362_v15  ;;  %v428_v20 = vpop.f32.mrb[2].mxu0 }
  0xfc   : > { %v431_v21 = vmax.f32 %v425_v17, 0.0  ;;  %v429_v22 = vpop.f32.mrb[3].mxu0 }
  0xfd   : > { %v432_v25 = vmax.f32 %v427_v19, 0.0 }
  0xfe   : > { %v439_v26 = vmul.f32 %v437_v24, %v431_v21 }
  0xff   : > { %v440_v27 = vmul.f32 %v437_v24, %v432_v25 }
 0x100   : > { %v441_v28 = vrot.slane %v439_v26, 4 }
 0x101   : > { %v447_v30 = vrot.slane %v440_v27, 4 }
 0x102   : > { %v442_v31 = vadd.f32 %v441_v28, %v439_v26 }
 0x103   : > { %v448_v32 = vadd.f32 %v447_v30, %v440_v27 }
 0x104   : > { %v443_v33 = vrot.slane %v442_v31, 2 }
 0x105   : > { %v449_v35 = vrot.slane %v448_v32, 2 }
 0x106   : > { %v444_v37 = vadd.f32 %v443_v33, %v442_v31 }
 0x107   : > { %v450_v38 = vadd.f32 %v449_v35, %v448_v32 }
 0x108   : > { %v445_v39 = vrot.slane %v444_v37, 1 }
 0x109   : > { %v451_v41 = vrot.slane %v450_v38, 1 }
 0x10a   : > { %v446_v42 = vadd.f32 %v445_v39, %v444_v37 }
 0x10b   : > { %v452_v43 = vadd.f32 %v451_v41, %v450_v38 }
 0x10c   : > { %v463_v44 = vadd.f32 %v462_v40, %v446_v42 }
 0x10d   : > { %v464_v45 = vadd.f32 %v462_v40, %v452_v43 }
 0x10e   : > { %v617_v46 = vmul.f32 -1.442695, %v463_v44 }
 0x10f   : > { %v618_v47 = vmul.f32 -1.442695, %v464_v45 }
 0x110   : > { %655 = vpow2.f32 %v617_v46 }
 0x111   : > { %657 = vpow2.f32 %v618_v47 }
 0x11a   : > { %v656_v48 = vpop.eup %655 }
 0x11b   : > { %v658_v49 = vpop.eup %657  ;;  %v471_v50 = vadd.f32 1.0, %v656_v48 }
 0x11c   : > { %v472_v51 = vadd.f32 1.0, %v658_v49 }
 0x11d   : > { %659 = vrcp.f32 %v471_v50 }
 0x11e   : > { %661 = vrcp.f32 %v472_v51 }
 0x127   : > { %v660_v55 = vpop.eup %659 }
 0x128   : > { %v662_v57 = vpop.eup %661 }
 0x129   : > { %v619_v58 = vpack.c.bf16 %v662_v57, %v660_v55 }
 0x12b   : > { %v488_v59 = vrot.slane %v619_v58, %v487_v56 }
 0x12d   : > { %v490_v60 = vmul.bf16 %v488_v59, %v760_v5 }
 0x12f   : > { %v491_v61 = vunpack.c.l.bf16 %v490_v60 }
 0x131   : > { %492 = vst [vmem:[%s327_s18] sm:$0xff] %v491_v61 }
 0x132 PF: > { %s18_s25 = sadd.s32 1, %s685_s25   ;;  %s787_s23 = smov %s681_s24 }
 0x133   : > { %p15_p5 = scmp.ge.s32.totalorder %s18_s25, 4   ;;  %s788_s24 = smov %s790_s5 }
 0x135   :  { %17 = sbr.rel (!%p15_p5) target bundleno = 3 (0x3), region = 77 }

</bundles_post_ra>
